<compile_context>
chip_gen: v5e
topology: v5e:2x2
jax: 0.10.0
libtpu: 0.0.40
codegen_flags: <defaults>
</compile_context>

<pallas_src>
import jax
import jax.numpy as jnp
from jax.experimental import pallas as pl
from jax.experimental.pallas import tpu as pltpu


def _round_up(x, m):
    return (x + m - 1) // m * m


def prepare_params(params, tile_v=2048, weight_dtype=jnp.bfloat16):
    """One-time parameter preprocessing (transposes / splits / bf16 cast / tiling)."""
    emb_tbl = params["embedding"]                      # (V, E), kept f32 (tiny gather)
    V, E = emb_tbl.shape
    H = params["w_hh"].shape[1]

    # LSTM weights, PyTorch layout (4H, E+H) with gates stacked [i, f, g, o].
    # Per-gate (in, H) layout: gate index on a leading (non-lane) axis, no lane concat.
    w_ih = params["w_ih"].reshape(4, H, E + H)
    w_emb = jnp.transpose(w_ih[:, :, :E], (0, 2, 1)).astype(weight_dtype)   # (4, E, H)
    w_ctx = jnp.transpose(w_ih[:, :, E:], (0, 2, 1)).astype(weight_dtype)   # (4, H, H)
    w_hh = jnp.transpose(params["w_hh"].reshape(4, H, H), (0, 2, 1)).astype(weight_dtype)
    b_gates = (params["b_ih"] + params["b_hh"]).reshape(4, 1, H).astype(jnp.float32)

    # fc: (V, 2H) -> merged (2H, V_pad), padded so logits tiles are lane-dense, then
    # pre-reshaped to (n_tiles, 2H, tv) so each vocab tile is contiguous in HBM.
    tv = tile_v if V >= tile_v else _round_up(V, 128)
    v_pad = _round_up(V, tv)
    n_tiles = v_pad // tv
    fc_w_t = jnp.zeros((2 * H, v_pad), jnp.float32).at[:, :V].set(params["fc_w"].T)
    w_fc = (fc_w_t.reshape(2 * H, n_tiles, tv)
            .transpose(1, 0, 2)                         # (n_tiles, 2H, tv) contiguous
            .astype(weight_dtype))
    b_fc = jnp.zeros((1, v_pad), jnp.float32).at[:, :V].set(params["fc_b"])

    return {
        "embedding": emb_tbl, "w_emb": w_emb, "w_ctx": w_ctx, "w_hh": w_hh,
        "b_gates": b_gates, "w_fc": w_fc, "b_fc": b_fc,
        "V": V, "V_pad": v_pad, "tile_v": tv, "n_tiles": n_tiles,
        "E": E, "H": H, "w_dtype": weight_dtype,
    }


# ----------------------------------------------------------------------------------
# Kernel 1: Luong dot-attention + single-step LSTM (runs once per decode step).
# ----------------------------------------------------------------------------------
def attn_lstm_kernel(emb_ref, h_ref, c_ref, enc_ref,
                     w_emb_ref, w_ctx_ref, w_hh_ref, b_ref,
                     state_ref, hc_ref):
    emb = emb_ref[...]                         # (B, E) f32
    h0 = h_ref[...]                            # (B, H) f32
    c0 = c_ref[...]                            # (B, H) f32
    enc = enc_ref[...]                         # (B, S, H) f32
    B, H = h0.shape

    # ---- Luong dot attention on the MXU (flash-style batched einsums) ----
    q = h0[:, None, :]                                                   # (B, 1, H)
    scores = jnp.einsum("bqh,bsh->bqs", q, enc,
                        preferred_element_type=jnp.float32)              # (B, 1, S)
    m = jnp.max(scores, axis=-1, keepdims=True)
    e = jnp.exp(scores - m)
    denom = jnp.sum(e, axis=-1, keepdims=True)
    attn = e * pl.reciprocal(denom, approx=True)                         # EUP slot
    ctx = jnp.einsum("bqs,bsh->bqh", attn, enc,
                     preferred_element_type=jnp.float32).reshape(B, H)   # (B, H)

    # ---- single-step LSTM, PyTorch gate order (i, f, g, o) ----
    wdt = w_emb_ref.dtype                      # bf16 weights, f32 accumulation
    emb_w = emb.astype(wdt)
    ctx_w = ctx.astype(wdt)
    h0_w = h0.astype(wdt)

    def gate(g):
        return (jnp.dot(emb_w, w_emb_ref[g], preferred_element_type=jnp.float32)
                + jnp.dot(ctx_w, w_ctx_ref[g], preferred_element_type=jnp.float32)
                + jnp.dot(h0_w, w_hh_ref[g], preferred_element_type=jnp.float32)
                + b_ref[g])

    i_g = jax.nn.sigmoid(gate(0))
    f_g = jax.nn.sigmoid(gate(1))
    g_g = jnp.tanh(gate(2))
    o_g = jax.nn.sigmoid(gate(3))
    c_new = f_g * c0 + i_g * g_g
    h_new = o_g * jnp.tanh(c_new)

    state_ref[0] = h_new                       # packed (h_new, c_new) output, f32
    state_ref[1] = c_new
    # Fused fc activation [h_new | ctx], bf16, built once (lane concat is one-time).
    hc_ref[...] = jnp.concatenate([h_new, ctx], axis=1).astype(hc_ref.dtype)


# ----------------------------------------------------------------------------------
# Kernel 2: fc over lane-dense vocab tiles (HBM-bound weight streaming).
# ----------------------------------------------------------------------------------
def fc_kernel(hc_ref, w_ref, b_ref, logits_ref):
    logits_ref[...] = (
        jnp.dot(hc_ref[...], w_ref[...], preferred_element_type=jnp.float32)
        + b_ref[...])


def decoder_forward(input_ids, hidden, cell, encoder_outputs, prep):
    """input_ids: (B,) int32, hidden/cell: (1, B, H), encoder_outputs: (B, S, H)."""
    # TODO(synk): fuse the embedding row gather via scalar prefetch + pl.Element once a
    # batch grid axis exists; at B=2 it is a single tiny XLA gather.
    embedded = prep["embedding"][input_ids]            # (B, E) f32
    h0 = hidden[-1]
    c0 = cell[-1]
    B, S, H = encoder_outputs.shape
    E, V, v_pad, tv = prep["E"], prep["V"], prep["V_pad"], prep["tile_v"]
    n_tiles = prep["n_tiles"]
    w_dtype = prep["w_dtype"]
    vmem_limit = 48 * 1024 * 1024                      # fits v7x's 64 MiB physical VMEM

    # --- Kernel 1: attention + LSTM (single shot; every weight fetched exactly once) ---
    state, hc = pl.pallas_call(
        attn_lstm_kernel,
        out_shape=(jax.ShapeDtypeStruct((2, B, H), jnp.float32),
                   jax.ShapeDtypeStruct((B, 2 * H), w_dtype)),
        grid_spec=pltpu.PrefetchScalarGridSpec(
            num_scalar_prefetch=0,
            grid=(1,),
            in_specs=[
                pl.BlockSpec((B, E), lambda i: (0, 0)),            # embedded
                pl.BlockSpec((B, H), lambda i: (0, 0)),            # h0
                pl.BlockSpec((B, H), lambda i: (0, 0)),            # c0
                pl.BlockSpec((B, S, H), lambda i: (0, 0, 0)),      # encoder_outputs
                pl.BlockSpec((4, E, H), lambda i: (0, 0, 0)),      # w_emb (per-gate, bf16)
                pl.BlockSpec((4, H, H), lambda i: (0, 0, 0)),      # w_ctx (per-gate, bf16)
                pl.BlockSpec((4, H, H), lambda i: (0, 0, 0)),      # w_hh  (per-gate, bf16)
                pl.BlockSpec((4, 1, H), lambda i: (0, 0, 0)),      # pre-summed gate bias
            ],
            out_specs=(
                pl.BlockSpec((2, B, H), lambda i: (0, 0, 0)),      # packed (h_new, c_new)
                pl.BlockSpec((B, 2 * H), lambda i: (0, 0)),        # [h_new | ctx], bf16
            ),
        ),
        compiler_params=pltpu.CompilerParams(
            dimension_semantics=("arbitrary",),
            vmem_limit_bytes=vmem_limit,
        ),
    )(embedded, h0, c0, encoder_outputs,
      prep["w_emb"], prep["w_ctx"], prep["w_hh"], prep["b_gates"])

    # --- Kernel 2: vocab-tiled fc; "parallel" axis (no scratch-carry), contiguous
    #     pre-tiled bf16 weight, one dot + one bias add per lane-dense tile. ---
    wbytes = jnp.dtype(w_dtype).itemsize
    cost = pl.CostEstimate(
        flops=2 * B * 2 * H * v_pad,
        transcendentals=0,
        bytes_accessed=(2 * H * v_pad * wbytes        # fc weight stream (dominant)
                        + v_pad * 4                   # fc bias
                        + B * 2 * H * wbytes          # activation
                        + B * v_pad * 4),             # logits out
    )

    logits_pad = pl.pallas_call(
        fc_kernel,
        out_shape=jax.ShapeDtypeStruct((B, v_pad), jnp.float32),
        grid_spec=pltpu.PrefetchScalarGridSpec(
            num_scalar_prefetch=0,
            grid=(n_tiles,),
            in_specs=[
                pl.BlockSpec((B, 2 * H), lambda j: (0, 0)),        # [h_new | ctx] (tiny)
                pl.BlockSpec((None, 2 * H, tv), lambda j: (j, 0, 0)),  # contiguous fc tile
                pl.BlockSpec((1, tv), lambda j: (0, j)),           # fc bias tile
            ],
            out_specs=pl.BlockSpec((B, tv), lambda j: (0, j)),     # lane-dense logits
        ),
        compiler_params=pltpu.CompilerParams(
            dimension_semantics=("parallel",),       # independent tiles -> v7x dual-TC
            vmem_limit_bytes=vmem_limit,
        ),
        cost_estimate=cost,
    )(hc, prep["w_fc"], prep["b_fc"])

    logits = logits_pad[:, :V] if v_pad != V else logits_pad
    return logits, state[0][None], state[1][None]


def reference_forward(input_ids, hidden, cell, encoder_outputs, params):
    """Pure-JAX f32 reference matching the PyTorch Decoder.forward semantics."""
    embedded = params["embedding"][input_ids]                       # (B, E)
    h0, c0 = hidden[-1], cell[-1]
    scores = jnp.einsum("bsh,bh->bs", encoder_outputs, h0)
    attn_w = jax.nn.softmax(scores, axis=1)
    ctx = jnp.einsum("bs,bsh->bh", attn_w, encoder_outputs)
    x = jnp.concatenate([embedded, ctx], axis=1)
    gates = x @ params["w_ih"].T + params["b_ih"] + h0 @ params["w_hh"].T + params["b_hh"]
    H = h0.shape[1]
    i_g = jax.nn.sigmoid(gates[:, 0 * H:1 * H])
    f_g = jax.nn.sigmoid(gates[:, 1 * H:2 * H])
    g_g = jnp.tanh(gates[:, 2 * H:3 * H])
    o_g = jax.nn.sigmoid(gates[:, 3 * H:4 * H])
    c_new = f_g * c0 + i_g * g_g
    h_new = o_g * jnp.tanh(c_new)
    out = jnp.concatenate([h_new, ctx], axis=1) @ params["fc_w"].T + params["fc_b"]
    return out, h_new[None], c_new[None]


if __name__ == "__main__":
    # Small, module-consistent sizes.
    VOCAB, EMB, HID = 64, 32, 32
    B, S = 2, 8

    key = jax.random.PRNGKey(0)
    keys = jax.random.split(key, 10)
    params = {
        "embedding": 0.1 * jax.random.normal(keys[0], (VOCAB, EMB), jnp.float32),
        "w_ih": 0.1 * jax.random.normal(keys[1], (4 * HID, EMB + HID), jnp.float32),
        "w_hh": 0.1 * jax.random.normal(keys[2], (4 * HID, HID), jnp.float32),
        "b_ih": 0.1 * jax.random.normal(keys[3], (4 * HID,), jnp.float32),
        "b_hh": 0.1 * jax.random.normal(keys[4], (4 * HID,), jnp.float32),
        "fc_w": 0.1 * jax.random.normal(keys[5], (VOCAB, 2 * HID), jnp.float32),
        "fc_b": 0.1 * jax.random.normal(keys[6], (VOCAB,), jnp.float32),
        # NOTE: LuongAttention.attn (nn.Linear) is defined in the PyTorch module but
        # never used in forward, so it is intentionally omitted here.
    }

    input_ids = jax.random.randint(keys[7], (B,), 0, VOCAB, dtype=jnp.int32)
    hidden = 0.1 * jax.random.normal(keys[8], (1, B, HID), jnp.float32)
    cell = 0.1 * jax.random.normal(keys[9], (1, B, HID), jnp.float32)
    encoder_outputs = 0.1 * jax.random.normal(jax.random.PRNGKey(1), (B, S, HID), jnp.float32)

    prep = prepare_params(params)   # one-time preprocessing (not per decode step)

    logits, h_new, c_new = decoder_forward(input_ids, hidden, cell, encoder_outputs, prep)
    jax.block_until_ready((logits, h_new, c_new))

    ref_logits, ref_h, ref_c = reference_forward(input_ids, hidden, cell, encoder_outputs, params)
    assert logits.shape == (B, VOCAB) and h_new.shape == (1, B, HID) and c_new.shape == (1, B, HID)
    # bf16 weight streaming (f32 accumulation) + approx softmax reciprocal -> loosened tol.
    assert jnp.allclose(logits, ref_logits, atol=2e-3)
    assert jnp.allclose(h_new, ref_h, atol=2e-3)
    assert jnp.allclose(c_new, ref_c, atol=2e-3)

    print("KERNEL_OK")
</pallas_src>

<mosaic_0001>
module attributes {stable_mosaic.version = 11 : i64} {
  func.func @attn_lstm_kernel(%arg0: i32, %arg1: memref<2x32xf32, #tpu.memory_space<vmem>>, %arg2: memref<2x32xf32, #tpu.memory_space<vmem>>, %arg3: memref<2x32xf32, #tpu.memory_space<vmem>>, %arg4: memref<2x8x32xf32, #tpu.memory_space<vmem>>, %arg5: memref<4x32x32xbf16, #tpu.memory_space<vmem>>, %arg6: memref<4x32x32xbf16, #tpu.memory_space<vmem>>, %arg7: memref<4x32x32xbf16, #tpu.memory_space<vmem>>, %arg8: memref<4x1x32xf32, #tpu.memory_space<vmem>>, %arg9: memref<2x2x32xf32, #tpu.memory_space<vmem>>, %arg10: memref<2x64xbf16, #tpu.memory_space<vmem>>) attributes {dimension_semantics = [#tpu.dimension_semantics<arbitrary>], iteration_bounds = array<i64: 1>, scalar_prefetch = 0 : i64, scratch_operands = 0 : i64, tpu.core_type = #tpu.core_type<tc>, window_params = [{pipeline_mode = #tpu.pipeline_mode<synchronous>, transform_indices = @transform_0, window_bounds = array<i64: 2, 32>}, {pipeline_mode = #tpu.pipeline_mode<synchronous>, transform_indices = @transform_1, window_bounds = array<i64: 2, 32>}, {pipeline_mode = #tpu.pipeline_mode<synchronous>, transform_indices = @transform_2, window_bounds = array<i64: 2, 32>}, {pipeline_mode = #tpu.pipeline_mode<synchronous>, transform_indices = @transform_3, window_bounds = array<i64: 2, 8, 32>}, {pipeline_mode = #tpu.pipeline_mode<synchronous>, transform_indices = @transform_4, window_bounds = array<i64: 4, 32, 32>}, {pipeline_mode = #tpu.pipeline_mode<synchronous>, transform_indices = @transform_5, window_bounds = array<i64: 4, 32, 32>}, {pipeline_mode = #tpu.pipeline_mode<synchronous>, transform_indices = @transform_6, window_bounds = array<i64: 4, 32, 32>}, {pipeline_mode = #tpu.pipeline_mode<synchronous>, transform_indices = @transform_7, window_bounds = array<i64: 4, 1, 32>}, {pipeline_mode = #tpu.pipeline_mode<synchronous>, transform_indices = @transform_8, window_bounds = array<i64: 2, 2, 32>}, {pipeline_mode = #tpu.pipeline_mode<synchronous>, transform_indices = @transform_9, window_bounds = array<i64: 2, 64>}]} {
    %c0 = arith.constant 0 : index
    %c0_0 = arith.constant 0 : index
    %0 = vector.load %arg1[%c0, %c0_0] : memref<2x32xf32, #tpu.memory_space<vmem>>, vector<2x32xf32>
    %c0_1 = arith.constant 0 : index
    %c0_2 = arith.constant 0 : index
    %1 = vector.load %arg2[%c0_1, %c0_2] : memref<2x32xf32, #tpu.memory_space<vmem>>, vector<2x32xf32>
    %c0_3 = arith.constant 0 : index
    %c0_4 = arith.constant 0 : index
    %2 = vector.load %arg3[%c0_3, %c0_4] : memref<2x32xf32, #tpu.memory_space<vmem>>, vector<2x32xf32>
    %c0_5 = arith.constant 0 : index
    %c0_6 = arith.constant 0 : index
    %c0_7 = arith.constant 0 : index
    %3 = vector.load %arg4[%c0_5, %c0_6, %c0_7] : memref<2x8x32xf32, #tpu.memory_space<vmem>>, vector<2x8x32xf32>
    %4 = vector.shape_cast %1 : vector<2x32xf32> to vector<2x1x32xf32>
    "tpu.trace_start"() <{level = 10 : i32, message = "bqh,bsh->bqs"}> : () -> ()
    %cst = arith.constant dense<0.000000e+00> : vector<2x1x8xf32>
    %5 = tpu.matmul %4, %3, %cst {dimension_numbers = #tpu.dot_dimension_numbers<[2], [2], [1], [1], [0, 0, 0, 1, 1, 1], [0], [0]>} : vector<2x1x32xf32>, vector<2x8x32xf32>, vector<2x1x8xf32> -> vector<2x1x8xf32>
    "tpu.trace_stop"() : () -> ()
    %cst_8 = arith.constant dense<0xFF800000> : vector<2x1xf32>
    %6 = vector.multi_reduction <maximumf>, %5, %cst_8 [2] : vector<2x1x8xf32> to vector<2x1xf32>
    %7 = vector.shape_cast %6 : vector<2x1xf32> to vector<2x1x1xf32>
    %8 = vector.broadcast %7 : vector<2x1x1xf32> to vector<2x1x8xf32>
    %9 = arith.subf %5, %8 : vector<2x1x8xf32>
    %10 = math.exp %9 : vector<2x1x8xf32>
    %cst_9 = arith.constant dense<0.000000e+00> : vector<2x1xf32>
    %11 = vector.multi_reduction <add>, %10, %cst_9 [2] : vector<2x1x8xf32> to vector<2x1xf32>
    %12 = vector.shape_cast %11 : vector<2x1xf32> to vector<2x1x1xf32>
    %13 = tpu.reciprocal %12 {approx = true} : vector<2x1x1xf32> -> vector<2x1x1xf32>
    %14 = vector.broadcast %13 : vector<2x1x1xf32> to vector<2x1x8xf32>
    %15 = arith.mulf %10, %14 : vector<2x1x8xf32>
    "tpu.trace_start"() <{level = 10 : i32, message = "bqs,bsh->bqh"}> : () -> ()
    %cst_10 = arith.constant dense<0.000000e+00> : vector<2x1x32xf32>
    %16 = tpu.matmul %15, %3, %cst_10 {dimension_numbers = #tpu.dot_dimension_numbers<[2], [1], [1], [2], [0, 0, 0, 1, 1, 2], [0], [0]>} : vector<2x1x8xf32>, vector<2x8x32xf32>, vector<2x1x32xf32> -> vector<2x1x32xf32>
    "tpu.trace_stop"() : () -> ()
    %17 = vector.shape_cast %16 : vector<2x1x32xf32> to vector<2x32xf32>
    %18 = arith.truncf %0 : vector<2x32xf32> to vector<2x32xbf16>
    %19 = arith.truncf %17 : vector<2x32xf32> to vector<2x32xbf16>
    %20 = arith.truncf %1 : vector<2x32xf32> to vector<2x32xbf16>
    %c0_11 = arith.constant 0 : index
    %c0_12 = arith.constant 0 : index
    %c0_13 = arith.constant 0 : index
    %21 = vector.load %arg5[%c0_11, %c0_12, %c0_13] : memref<4x32x32xbf16, #tpu.memory_space<vmem>>, vector<1x32x32xbf16>
    %22 = vector.shape_cast %21 : vector<1x32x32xbf16> to vector<32x32xbf16>
    %cst_14 = arith.constant dense<0.000000e+00> : vector<2x32xf32>
    %23 = tpu.matmul %18, %22, %cst_14 {dimension_numbers = #tpu.dot_dimension_numbers<[1], [0], [0], [1], [0, 0, 1, 1], [], []>} : vector<2x32xbf16>, vector<32x32xbf16>, vector<2x32xf32> -> vector<2x32xf32>
    %c0_15 = arith.constant 0 : index
    %c0_16 = arith.constant 0 : index
    %c0_17 = arith.constant 0 : index
    %24 = vector.load %arg6[%c0_15, %c0_16, %c0_17] : memref<4x32x32xbf16, #tpu.memory_space<vmem>>, vector<1x32x32xbf16>
    %25 = vector.shape_cast %24 : vector<1x32x32xbf16> to vector<32x32xbf16>
    %cst_18 = arith.constant dense<0.000000e+00> : vector<2x32xf32>
    %26 = tpu.matmul %19, %25, %cst_18 {dimension_numbers = #tpu.dot_dimension_numbers<[1], [0], [0], [1], [0, 0, 1, 1], [], []>} : vector<2x32xbf16>, vector<32x32xbf16>, vector<2x32xf32> -> vector<2x32xf32>
    %27 = arith.addf %23, %26 : vector<2x32xf32>
    %c0_19 = arith.constant 0 : index
    %c0_20 = arith.constant 0 : index
    %c0_21 = arith.constant 0 : index
    %28 = vector.load %arg7[%c0_19, %c0_20, %c0_21] : memref<4x32x32xbf16, #tpu.memory_space<vmem>>, vector<1x32x32xbf16>
    %29 = vector.shape_cast %28 : vector<1x32x32xbf16> to vector<32x32xbf16>
    %cst_22 = arith.constant dense<0.000000e+00> : vector<2x32xf32>
    %30 = tpu.matmul %20, %29, %cst_22 {dimension_numbers = #tpu.dot_dimension_numbers<[1], [0], [0], [1], [0, 0, 1, 1], [], []>} : vector<2x32xbf16>, vector<32x32xbf16>, vector<2x32xf32> -> vector<2x32xf32>
    %31 = arith.addf %27, %30 : vector<2x32xf32>
    %c0_23 = arith.constant 0 : index
    %c0_24 = arith.constant 0 : index
    %c0_25 = arith.constant 0 : index
    %32 = vector.load %arg8[%c0_23, %c0_24, %c0_25] : memref<4x1x32xf32, #tpu.memory_space<vmem>>, vector<1x1x32xf32>
    %33 = vector.shape_cast %32 : vector<1x1x32xf32> to vector<1x32xf32>
    %34 = vector.broadcast %33 : vector<1x32xf32> to vector<2x32xf32>
    %35 = arith.addf %31, %34 : vector<2x32xf32>
    %36 = arith.negf %35 : vector<2x32xf32>
    %37 = math.exp %36 : vector<2x32xf32>
    %cst_26 = arith.constant 1.000000e+00 : f32
    %38 = vector.broadcast %cst_26 : f32 to vector<2x32xf32>
    %39 = arith.addf %38, %37 : vector<2x32xf32>
    %40 = arith.divf %38, %39 : vector<2x32xf32>
    %c1 = arith.constant 1 : index
    %c0_27 = arith.constant 0 : index
    %c0_28 = arith.constant 0 : index
    %41 = vector.load %arg5[%c1, %c0_27, %c0_28] : memref<4x32x32xbf16, #tpu.memory_space<vmem>>, vector<1x32x32xbf16>
    %42 = vector.shape_cast %41 : vector<1x32x32xbf16> to vector<32x32xbf16>
    %cst_29 = arith.constant dense<0.000000e+00> : vector<2x32xf32>
    %43 = tpu.matmul %18, %42, %cst_29 {dimension_numbers = #tpu.dot_dimension_numbers<[1], [0], [0], [1], [0, 0, 1, 1], [], []>} : vector<2x32xbf16>, vector<32x32xbf16>, vector<2x32xf32> -> vector<2x32xf32>
    %c1_30 = arith.constant 1 : index
    %c0_31 = arith.constant 0 : index
    %c0_32 = arith.constant 0 : index
    %44 = vector.load %arg6[%c1_30, %c0_31, %c0_32] : memref<4x32x32xbf16, #tpu.memory_space<vmem>>, vector<1x32x32xbf16>
    %45 = vector.shape_cast %44 : vector<1x32x32xbf16> to vector<32x32xbf16>
    %cst_33 = arith.constant dense<0.000000e+00> : vector<2x32xf32>
    %46 = tpu.matmul %19, %45, %cst_33 {dimension_numbers = #tpu.dot_dimension_numbers<[1], [0], [0], [1], [0, 0, 1, 1], [], []>} : vector<2x32xbf16>, vector<32x32xbf16>, vector<2x32xf32> -> vector<2x32xf32>
    %47 = arith.addf %43, %46 : vector<2x32xf32>
    %c1_34 = arith.constant 1 : index
    %c0_35 = arith.constant 0 : index
    %c0_36 = arith.constant 0 : index
    %48 = vector.load %arg7[%c1_34, %c0_35, %c0_36] : memref<4x32x32xbf16, #tpu.memory_space<vmem>>, vector<1x32x32xbf16>
    %49 = vector.shape_cast %48 : vector<1x32x32xbf16> to vector<32x32xbf16>
    %cst_37 = arith.constant dense<0.000000e+00> : vector<2x32xf32>
    %50 = tpu.matmul %20, %49, %cst_37 {dimension_numbers = #tpu.dot_dimension_numbers<[1], [0], [0], [1], [0, 0, 1, 1], [], []>} : vector<2x32xbf16>, vector<32x32xbf16>, vector<2x32xf32> -> vector<2x32xf32>
    %51 = arith.addf %47, %50 : vector<2x32xf32>
    %c1_38 = arith.constant 1 : index
    %c0_39 = arith.constant 0 : index
    %c0_40 = arith.constant 0 : index
    %52 = vector.load %arg8[%c1_38, %c0_39, %c0_40] : memref<4x1x32xf32, #tpu.memory_space<vmem>>, vector<1x1x32xf32>
    %53 = vector.shape_cast %52 : vector<1x1x32xf32> to vector<1x32xf32>
    %54 = vector.broadcast %53 : vector<1x32xf32> to vector<2x32xf32>
    %55 = arith.addf %51, %54 : vector<2x32xf32>
    %56 = arith.negf %55 : vector<2x32xf32>
    %57 = math.exp %56 : vector<2x32xf32>
    %cst_41 = arith.constant 1.000000e+00 : f32
    %58 = vector.broadcast %cst_41 : f32 to vector<2x32xf32>
    %59 = arith.addf %58, %57 : vector<2x32xf32>
    %60 = arith.divf %58, %59 : vector<2x32xf32>
    %c2 = arith.constant 2 : index
    %c0_42 = arith.constant 0 : index
    %c0_43 = arith.constant 0 : index
    %61 = vector.load %arg5[%c2, %c0_42, %c0_43] : memref<4x32x32xbf16, #tpu.memory_space<vmem>>, vector<1x32x32xbf16>
    %62 = vector.shape_cast %61 : vector<1x32x32xbf16> to vector<32x32xbf16>
    %cst_44 = arith.constant dense<0.000000e+00> : vector<2x32xf32>
    %63 = tpu.matmul %18, %62, %cst_44 {dimension_numbers = #tpu.dot_dimension_numbers<[1], [0], [0], [1], [0, 0, 1, 1], [], []>} : vector<2x32xbf16>, vector<32x32xbf16>, vector<2x32xf32> -> vector<2x32xf32>
    %c2_45 = arith.constant 2 : index
    %c0_46 = arith.constant 0 : index
    %c0_47 = arith.constant 0 : index
    %64 = vector.load %arg6[%c2_45, %c0_46, %c0_47] : memref<4x32x32xbf16, #tpu.memory_space<vmem>>, vector<1x32x32xbf16>
    %65 = vector.shape_cast %64 : vector<1x32x32xbf16> to vector<32x32xbf16>
    %cst_48 = arith.constant dense<0.000000e+00> : vector<2x32xf32>
    %66 = tpu.matmul %19, %65, %cst_48 {dimension_numbers = #tpu.dot_dimension_numbers<[1], [0], [0], [1], [0, 0, 1, 1], [], []>} : vector<2x32xbf16>, vector<32x32xbf16>, vector<2x32xf32> -> vector<2x32xf32>
    %67 = arith.addf %63, %66 : vector<2x32xf32>
    %c2_49 = arith.constant 2 : index
    %c0_50 = arith.constant 0 : index
    %c0_51 = arith.constant 0 : index
    %68 = vector.load %arg7[%c2_49, %c0_50, %c0_51] : memref<4x32x32xbf16, #tpu.memory_space<vmem>>, vector<1x32x32xbf16>
    %69 = vector.shape_cast %68 : vector<1x32x32xbf16> to vector<32x32xbf16>
    %cst_52 = arith.constant dense<0.000000e+00> : vector<2x32xf32>
    %70 = tpu.matmul %20, %69, %cst_52 {dimension_numbers = #tpu.dot_dimension_numbers<[1], [0], [0], [1], [0, 0, 1, 1], [], []>} : vector<2x32xbf16>, vector<32x32xbf16>, vector<2x32xf32> -> vector<2x32xf32>
    %71 = arith.addf %67, %70 : vector<2x32xf32>
    %c2_53 = arith.constant 2 : index
    %c0_54 = arith.constant 0 : index
    %c0_55 = arith.constant 0 : index
    %72 = vector.load %arg8[%c2_53, %c0_54, %c0_55] : memref<4x1x32xf32, #tpu.memory_space<vmem>>, vector<1x1x32xf32>
    %73 = vector.shape_cast %72 : vector<1x1x32xf32> to vector<1x32xf32>
    %74 = vector.broadcast %73 : vector<1x32xf32> to vector<2x32xf32>
    %75 = arith.addf %71, %74 : vector<2x32xf32>
    %76 = math.tanh %75 : vector<2x32xf32>
    %c3 = arith.constant 3 : index
    %c0_56 = arith.constant 0 : index
    %c0_57 = arith.constant 0 : index
    %77 = vector.load %arg5[%c3, %c0_56, %c0_57] : memref<4x32x32xbf16, #tpu.memory_space<vmem>>, vector<1x32x32xbf16>
    %78 = vector.shape_cast %77 : vector<1x32x32xbf16> to vector<32x32xbf16>
    %cst_58 = arith.constant dense<0.000000e+00> : vector<2x32xf32>
    %79 = tpu.matmul %18, %78, %cst_58 {dimension_numbers = #tpu.dot_dimension_numbers<[1], [0], [0], [1], [0, 0, 1, 1], [], []>} : vector<2x32xbf16>, vector<32x32xbf16>, vector<2x32xf32> -> vector<2x32xf32>
    %c3_59 = arith.constant 3 : index
    %c0_60 = arith.constant 0 : index
    %c0_61 = arith.constant 0 : index
    %80 = vector.load %arg6[%c3_59, %c0_60, %c0_61] : memref<4x32x32xbf16, #tpu.memory_space<vmem>>, vector<1x32x32xbf16>
    %81 = vector.shape_cast %80 : vector<1x32x32xbf16> to vector<32x32xbf16>
    %cst_62 = arith.constant dense<0.000000e+00> : vector<2x32xf32>
    %82 = tpu.matmul %19, %81, %cst_62 {dimension_numbers = #tpu.dot_dimension_numbers<[1], [0], [0], [1], [0, 0, 1, 1], [], []>} : vector<2x32xbf16>, vector<32x32xbf16>, vector<2x32xf32> -> vector<2x32xf32>
    %83 = arith.addf %79, %82 : vector<2x32xf32>
    %c3_63 = arith.constant 3 : index
    %c0_64 = arith.constant 0 : index
    %c0_65 = arith.constant 0 : index
    %84 = vector.load %arg7[%c3_63, %c0_64, %c0_65] : memref<4x32x32xbf16, #tpu.memory_space<vmem>>, vector<1x32x32xbf16>
    %85 = vector.shape_cast %84 : vector<1x32x32xbf16> to vector<32x32xbf16>
    %cst_66 = arith.constant dense<0.000000e+00> : vector<2x32xf32>
    %86 = tpu.matmul %20, %85, %cst_66 {dimension_numbers = #tpu.dot_dimension_numbers<[1], [0], [0], [1], [0, 0, 1, 1], [], []>} : vector<2x32xbf16>, vector<32x32xbf16>, vector<2x32xf32> -> vector<2x32xf32>
    %87 = arith.addf %83, %86 : vector<2x32xf32>
    %c3_67 = arith.constant 3 : index
    %c0_68 = arith.constant 0 : index
    %c0_69 = arith.constant 0 : index
    %88 = vector.load %arg8[%c3_67, %c0_68, %c0_69] : memref<4x1x32xf32, #tpu.memory_space<vmem>>, vector<1x1x32xf32>
    %89 = vector.shape_cast %88 : vector<1x1x32xf32> to vector<1x32xf32>
    %90 = vector.broadcast %89 : vector<1x32xf32> to vector<2x32xf32>
    %91 = arith.addf %87, %90 : vector<2x32xf32>
    %92 = arith.negf %91 : vector<2x32xf32>
    %93 = math.exp %92 : vector<2x32xf32>
    %cst_70 = arith.constant 1.000000e+00 : f32
    %94 = vector.broadcast %cst_70 : f32 to vector<2x32xf32>
    %95 = arith.addf %94, %93 : vector<2x32xf32>
    %96 = arith.divf %94, %95 : vector<2x32xf32>
    %97 = arith.mulf %60, %2 : vector<2x32xf32>
    %98 = arith.mulf %40, %76 : vector<2x32xf32>
    %99 = arith.addf %97, %98 : vector<2x32xf32>
    %100 = math.tanh %99 : vector<2x32xf32>
    %101 = arith.mulf %96, %100 : vector<2x32xf32>
    %c0_71 = arith.constant 0 : index
    %c0_72 = arith.constant 0 : index
    %c0_73 = arith.constant 0 : index
    %102 = vector.load %arg9[%c0_71, %c0_72, %c0_73] : memref<2x2x32xf32, #tpu.memory_space<vmem>>, vector<1x2x32xf32>
    %103 = vector.shape_cast %102 : vector<1x2x32xf32> to vector<2x32xf32>
    %104 = vector.shape_cast %101 : vector<2x32xf32> to vector<1x2x32xf32>
    tpu.vector_store %arg9[%c0_71, %c0_72, %c0_73], %104 {strides = array<i32>} : memref<2x2x32xf32, #tpu.memory_space<vmem>>, vector<1x2x32xf32>,
    %c1_74 = arith.constant 1 : index
    %c0_75 = arith.constant 0 : index
    %c0_76 = arith.constant 0 : index
    %105 = vector.load %arg9[%c1_74, %c0_75, %c0_76] : memref<2x2x32xf32, #tpu.memory_space<vmem>>, vector<1x2x32xf32>
    %106 = vector.shape_cast %105 : vector<1x2x32xf32> to vector<2x32xf32>
    %107 = vector.shape_cast %99 : vector<2x32xf32> to vector<1x2x32xf32>
    tpu.vector_store %arg9[%c1_74, %c0_75, %c0_76], %107 {strides = array<i32>} : memref<2x2x32xf32, #tpu.memory_space<vmem>>, vector<1x2x32xf32>,
    %108 = tpu.concatenate %101, %17 in 1 : vector<2x32xf32>, vector<2x32xf32> -> vector<2x64xf32>
    %109 = arith.truncf %108 : vector<2x64xf32> to vector<2x64xbf16>
    %c0_77 = arith.constant 0 : index
    %c0_78 = arith.constant 0 : index
    %110 = vector.load %arg10[%c0_77, %c0_78] : memref<2x64xbf16, #tpu.memory_space<vmem>>, vector<2x64xbf16>
    tpu.vector_store %arg10[%c0_77, %c0_78], %109 {strides = array<i32>} : memref<2x64xbf16, #tpu.memory_space<vmem>>, vector<2x64xbf16>,
    return
  }
  func.func @transform_0(%arg0: i32) -> (i32, i32) {
    %c0_i32 = arith.constant 0 : i32
    %c0_i32_0 = arith.constant 0 : i32
    %c0_i32_1 = arith.constant 0 : i32
    return %c0_i32, %c0_i32_0 : i32, i32
  }
  func.func @transform_1(%arg0: i32) -> (i32, i32) {
    %c0_i32 = arith.constant 0 : i32
    %c0_i32_0 = arith.constant 0 : i32
    %c0_i32_1 = arith.constant 0 : i32
    return %c0_i32, %c0_i32_0 : i32, i32
  }
  func.func @transform_2(%arg0: i32) -> (i32, i32) {
    %c0_i32 = arith.constant 0 : i32
    %c0_i32_0 = arith.constant 0 : i32
    %c0_i32_1 = arith.constant 0 : i32
    return %c0_i32, %c0_i32_0 : i32, i32
  }
  func.func @transform_3(%arg0: i32) -> (i32, i32, i32) {
    %c0_i32 = arith.constant 0 : i32
    %c0_i32_0 = arith.constant 0 : i32
    %c0_i32_1 = arith.constant 0 : i32
    %c0_i32_2 = arith.constant 0 : i32
    return %c0_i32, %c0_i32_0, %c0_i32_1 : i32, i32, i32
  }
  func.func @transform_4(%arg0: i32) -> (i32, i32, i32) {
    %c0_i32 = arith.constant 0 : i32
    %c0_i32_0 = arith.constant 0 : i32
    %c0_i32_1 = arith.constant 0 : i32
    %c0_i32_2 = arith.constant 0 : i32
    return %c0_i32, %c0_i32_0, %c0_i32_1 : i32, i32, i32
  }
  func.func @transform_5(%arg0: i32) -> (i32, i32, i32) {
    %c0_i32 = arith.constant 0 : i32
    %c0_i32_0 = arith.constant 0 : i32
    %c0_i32_1 = arith.constant 0 : i32
    %c0_i32_2 = arith.constant 0 : i32
    return %c0_i32, %c0_i32_0, %c0_i32_1 : i32, i32, i32
  }
  func.func @transform_6(%arg0: i32) -> (i32, i32, i32) {
    %c0_i32 = arith.constant 0 : i32
    %c0_i32_0 = arith.constant 0 : i32
    %c0_i32_1 = arith.constant 0 : i32
    %c0_i32_2 = arith.constant 0 : i32
    return %c0_i32, %c0_i32_0, %c0_i32_1 : i32, i32, i32
  }
  func.func @transform_7(%arg0: i32) -> (i32, i32, i32) {
    %c0_i32 = arith.constant 0 : i32
    %c0_i32_0 = arith.constant 0 : i32
    %c0_i32_1 = arith.constant 0 : i32
    %c0_i32_2 = arith.constant 0 : i32
    return %c0_i32, %c0_i32_0, %c0_i32_1 : i32, i32, i32
  }
  func.func @transform_8(%arg0: i32) -> (i32, i32, i32) {
    %c0_i32 = arith.constant 0 : i32
    %c0_i32_0 = arith.constant 0 : i32
    %c0_i32_1 = arith.constant 0 : i32
    %c0_i32_2 = arith.constant 0 : i32
    return %c0_i32, %c0_i32_0, %c0_i32_1 : i32, i32, i32
  }
  func.func @transform_9(%arg0: i32) -> (i32, i32) {
    %c0_i32 = arith.constant 0 : i32
    %c0_i32_0 = arith.constant 0 : i32
    %c0_i32_1 = arith.constant 0 : i32
    return %c0_i32, %c0_i32_0 : i32, i32
  }
}

</mosaic_0001>

<bundles_post_ra>
// kernel: tpu_custom_call.1
= control target key start
LH: loop header
LB: loop body
LE: loop exit
PB: predicated region body
PF: predicated region fallthrough
CT: control target
= control target key end

     0   :  { %15 = vsyncpa [#allocation3], 0  ;;  %s1337_s0 = inlined_call_operand.hbm [shape: f32[2,32], index: 0, kind: input, shape index: {}]   ;;  %s1338_s1 = inlined_call_operand.hbm [shape: f32[2,32], index: 1, kind: input, shape index: {}]   ;;  %s1339_s2 = inlined_call_operand.hbm [shape: f32[2,32], index: 2, kind: input, shape index: {}]   ;;  %s1340_s3 = inlined_call_operand.hbm [shape: f32[2,8,32], index: 3, kind: input, shape index: {}]   ;;  %s1341_s4 = inlined_call_operand.hbm [shape: bf16[4,32,32], index: 4, kind: input, shape index: {}]   ;;  %s1342_s5 = inlined_call_operand.hbm [shape: bf16[4,32,32], index: 5, kind: input, shape index: {}]   ;;  %s1343_s6 = inlined_call_operand.hbm [shape: bf16[4,32,32], index: 6, kind: input, shape index: {}]   ;;  %s1344_s7 = inlined_call_operand.vmem [shape: f32[4,1,32], index: 7, kind: input, shape index: {}]   ;;  %s1345_s8 = inlined_call_operand.hbm [shape: f32[2,2,32], index: 8, kind: output, shape index: {0}]   ;;  %s1346_s9 = inlined_call_operand.hbm [shape: bf16[2,64], index: 9, kind: output, shape index: {1}]  }
   0x1   :  { %16 = vsyncpa [#allocation6], 0 }
   0x2   :  { %17 = vsyncpa [#allocation9], 0 }
   0x3   :  { %18 = vsyncpa [#allocation12], 0 }
   0x4   :  { %19 = vsyncpa [#allocation4], 0  ;;  %s37_s11 = sshll.u32 %s1338_s1, 4  ;;  %s38_s11 = int_to_ptr.hbm [resolvable:$true] %s37_s11 }
   0x5   :  { %20 = vsyncpa [#allocation16], 0  ;;  %s1201_s12 = smov [#allocation5]   ;;  %s58_s16 = sshll.u32 %s1340_s3, 4  ;;  %s59_s16 = int_to_ptr.hbm [resolvable:$true] %s58_s16 }
   0x6   :  { %s39_s13 = sshll.u32 %s1201_s12, 4  ;;  %s1202_s17 = smov [#allocation8]   ;;  %s40_s13 = int_to_ptr.vmem [resolvable:$true] %s39_s13 }
   0x7   :  { %42 = dma.hbm_to_vmem [thread:$0]  %s38_s11, 32, %s40_s13, [#allocation6]  }
   0x8   :  { %s60_s18 = sshll.u32 %s1202_s17, 4  ;;  %s1203_s19 = smov 128   ;;  %s61_s18 = int_to_ptr.vmem [resolvable:$true] %s60_s18 }
   0x9   :  { %s1204_s20 = smov 8   ;;  %s84_s1 = sshll.u32 %s1342_s5, 4  ;;  %s85_s1 = int_to_ptr.hbm [resolvable:$true] %s84_s1 }
   0xa   :  { %66 = dma.hbm_to_vmem [thread:$0]  %s59_s16, 256, %s61_s18, [#allocation9], %s1203_s19, %s1203_s19, %s1204_s20  }
   0xb   :  { %s1205_s23 = smov [#allocation11]   ;;  %s26_s3 = sshll.u32 %s1337_s0, 4  ;;  %s27_s3 = int_to_ptr.hbm [resolvable:$true] %s26_s3 }
   0xc   :  { %s86_s24 = sshll.u32 %s1205_s23, 4  ;;  %s1206_s27 = smov 64   ;;  %s87_s24 = int_to_ptr.vmem [resolvable:$true] %s86_s24 }
   0xd   :  { %s1207_s28 = smov 4   ;;  %s1208_s29 = smov [#allocation2]  }
   0xe   :  { %92 = dma.hbm_to_vmem [thread:$0]  %s85_s1, 1024, %s87_s24, [#allocation12], %s1206_s27, %s1206_s27, %s1207_s28  }
   0xf   :  { %s28_s30 = sshll.u32 %s1208_s29, 4  ;;  %s48_s12 = sshll.u32 %s1339_s2, 4  ;;  %s29_s30 = int_to_ptr.vmem [resolvable:$true] %s28_s30  ;;  %s49_s12 = int_to_ptr.hbm [resolvable:$true] %s48_s12 }
  0x10   :  { %31 = dma.hbm_to_vmem [thread:$0]  %s27_s3, 32, %s29_s30, [#allocation3]  }
  0x11   :  { %s71_s14 = sshll.u32 %s1341_s4, 4  ;;  %s1209_s15 = smov [#allocation7]   ;;  %s72_s14 = int_to_ptr.hbm [resolvable:$true] %s71_s14 }
  0x12   :  { %s50_s16 = sshll.u32 %s1209_s15, 4  ;;  %s1210_s0 = smov [#allocation10]   ;;  %s51_s16 = int_to_ptr.vmem [resolvable:$true] %s50_s16 }
  0x13   :  { %53 = dma.hbm_to_vmem [thread:$0]  %s49_s12, 32, %s51_s16, [#allocation6]  }
  0x14   :  { %s73_s17 = sshll.u32 %s1210_s0, 4  ;;  %s97_s20 = sshll.u32 %s1343_s6, 4  ;;  %s74_s17 = int_to_ptr.vmem [resolvable:$true] %s73_s17  ;;  %s98_s20 = int_to_ptr.hbm [resolvable:$true] %s97_s20 }
  0x15   :  { %79 = dma.hbm_to_vmem [thread:$0]  %s72_s14, 1024, %s74_s17, [#allocation9], %s1206_s27, %s1206_s27, %s1207_s28  }
  0x16   :  { %s1211_s2 = smov [#allocation13]  }
  0x17   :  { %s99_s21 = sshll.u32 %s1211_s2, 4  ;;  %s100_s21 = int_to_ptr.vmem [resolvable:$true] %s99_s21 }
  0x18   :  { %105 = dma.hbm_to_vmem [thread:$0]  %s98_s20, 1024, %s100_s21, [#allocation12], %s1206_s27, %s1206_s27, %s1207_s28  }
  0x19   :  { %1189 = dma.done.wait [#allocation3], 32  }
  0x1a   :  { %1190 = vsyncadd [#allocation3], 4294967264 }
  0x1b   :  { %1191 = dma.done.wait [#allocation6], 64  }
  0x1c   :  { %1192 = vsyncadd [#allocation6], 4294967232 }
  0x1d   :  { %1193 = dma.done.wait [#allocation9], 1280  }
  0x1e   :  { %1194 = vsyncadd [#allocation9], 4294966016 }
  0x1f   :  { %1195 = dma.done.wait [#allocation12], 2048  }
  0x20   :  { %1196 = vsyncadd [#allocation12], 4294965248  ;;  %vm144_vm0 = vcmask 261120   ;;  %v141_v0 = vld [vmem:[#allocation8 + $0x8] sm:$0xff]  ;;  %v138_v1 = vld [vmem:[#allocation5] sm:$0x3] }
  0x21   :  { %v140_v2 = vld [vmem:[#allocation8] sm:$0xff]  ;;  %788 = vmatpush.xpose.msk.msra.mxu1 %vm144_vm0, %v141_v0  ;;  %v143_v3 = vrot.slane %v138_v1, 1  ;;  %260 = vmatpush.msra.mxu3 %v141_v0  ;;  %vm195_vm1 = vcmask 57344   ;;  %v907_v18 = vld [vmem:[#allocation10 + $0x8] sm:$0xff]  ;;  %v906_v20 = vld [vmem:[#allocation10] sm:$0xff]  ;;  %vm218_vm2 = vcmask 64512   ;;  %v268_v32 = vpack.c.bf16 %v138_v1, %v138_v1 }
  0x22   :  { %786 = vmatpush.xpose.msk.msra.mxu0 %vm144_vm0, %v140_v2  ;;  %237 = vmatpush.msra.mxu2 %v140_v2  ;;  %v911_v19 = vld [vmem:[#allocation13 + $0x8] sm:$0xff]  ;;  %v910_v21 = vld [vmem:[#allocation13] sm:$0xff]  ;;  %v917_v24 = vld [vmem:[#allocation13 + $0x18] sm:$0xff]  ;;  %vm282_vm3 = vcmask 1041409   ;;  %s1212_s4 = smov 32   ;;  %vm733_vm12 = vcmask 254976  }
  0x23   :  { %334 = vmatpush.bf16.msrb.mxu3 %v907_v18  ;;  %v137_v27 = vld [vmem:[#allocation2] sm:$0x3]  ;;  %v916_v28 = vld [vmem:[#allocation13 + $0x10] sm:$0xff]  ;;  %v915_v34 = vld [vmem:[#allocation11 + $0x18] sm:$0xff]  ;;  %s754_s28 = sshll.u32 %s1345_s8, 4  ;;  %s1213_s29 = smov [#allocation14]   ;;  %s755_s28 = int_to_ptr.hbm [resolvable:$true] %s754_s28 }
  0x24   :  { %789 = vmatmul.msk.f32.vlgmr.msra.gmra.mxu1 %vm144_vm0, %v143_v3  ;;  %v1295_v29 = vpack.c.bf16 %v137_v27, %v137_v27  ;;  %v909_v33 = vld [vmem:[#allocation11 + $0x8] sm:$0xff]  ;;  %v927_v36 = vld [vmem:[#allocation11 + $0x38] sm:$0xff]  ;;  %v908_v37 = vld [vmem:[#allocation11] sm:$0xff]  ;;  %s752_s30 = sshll.u32 %s1213_s29, 4  ;;  %s1214_s10 = smov [#allocation15]   ;;  %s753_s30 = int_to_ptr.vmem [resolvable:$true] %s752_s30 }
  0x25   :  { %787 = vmatmul.msk.f32.vlgmr.msra.gmra.mxu0 %vm144_vm0, %v138_v1  ;;  %v921_v35 = vld [vmem:[#allocation11 + $0x28] sm:$0xff]  ;;  %306 = vmatpush.bf16.msrb.mxu2 %v909_v33  ;;  %v914_v38 = vld [vmem:[#allocation11 + $0x10] sm:$0xff]  ;;  %v920_v39 = vld [vmem:[#allocation11 + $0x20] sm:$0xff]  ;;  %s766_s11 = sshll.u32 %s1214_s10, 4  ;;  %s768_s13 = sshll.u32 %s1346_s9, 4  ;;  %s767_s11 = int_to_ptr.vmem [resolvable:$true] %s766_s11  ;;  %s769_s13 = int_to_ptr.hbm [resolvable:$true] %s768_s13 }
  0x26   :  { %366 = vmatpush.bf16.msrb.mxu0 %v911_v19  ;;  %426 = vmatpush.bf16.msrb.mxu1 %v915_v34  ;;  %v926_v40 = vld [vmem:[#allocation11 + $0x30] sm:$0xff]  ;;  %v913_v41 = vld [vmem:[#allocation10 + $0x18] sm:$0xff]  ;;  %v919_v42 = vld [vmem:[#allocation10 + $0x28] sm:$0xff]  ;;  %s1215_s8 = smov 2  }
  0x27   :  { %335 = vmatpush.bf16.msrb.mxu3 %v906_v20  ;;  %v925_v43 = vld [vmem:[#allocation10 + $0x38] sm:$0xff]  ;;  %v912_v44 = vld [vmem:[#allocation10 + $0x10] sm:$0xff]  ;;  %v918_v45 = vld [vmem:[#allocation10 + $0x20] sm:$0xff] }
  0x28   :  { %v924_v46 = vld [vmem:[#allocation10 + $0x30] sm:$0xff]  ;;  %v929_v58 = vld [vmem:[#allocation13 + $0x38] sm:$0xff]  ;;  %v923_v59 = vld [vmem:[#allocation13 + $0x28] sm:$0xff] }
  0x29   :  { %307 = vmatpush.bf16.msrb.mxu2 %v908_v37  ;;  %v928_v60 = vld [vmem:[#allocation13 + $0x30] sm:$0xff]  ;;  %v922_v61 = vld [vmem:[#allocation13 + $0x20] sm:$0xff] }
  0x2a   :  { %367 = vmatpush.bf16.msrb.mxu0 %v910_v21  ;;  %427 = vmatpush.bf16.msrb.mxu1 %v914_v38 }
  0x2d   :  { %818 = vmatmul.msk.bf16.vlgmr.msrb.gmra.mxu0 %vm144_vm0, %v268_v32 }
  0x2e   :  { %542 = vmatpush.bf16.msra.mxu0 %v921_v35  ;;  %567 = vmatpush.bf16.msra.mxu1 %v919_v42 }
  0x32   :  { %543 = vmatpush.bf16.msra.mxu0 %v920_v39  ;;  %568 = vmatpush.bf16.msra.mxu1 %v918_v45 }
  0x36   :  { %665 = vmatpush.bf16.msrb.mxu0 %v925_v43  ;;  %v948_v43 = vld [vmem:[%s1344_s7 + $0x2] ss:$0 sm:$0xff] }
  0x3a   :  { %666 = vmatpush.bf16.msrb.mxu0 %v924_v46 }
  0xa1   :  { %v192_v4 = vpop.f32.mrf.mxu1 }
  0xa2   :  { %v199_v5 = vsel %vm195_vm1, %v192_v4, -inf  ;;  %v167_v6 = vpop.f32.mrf.mxu0 }
  0xa3   :  { %200 = vmax.xlane.f32.xlu0 %v199_v5  ;;  %v196_v7 = vsel %vm195_vm1, %v167_v6, -inf }
  0xaa   :  { %v369_v0 = vpop.f32.mrf.mxu0 }
  0xab   :  { %197 = vmax.xlane.f32.xlu0 %v196_v7 }
  0xb2   :  { %v371_v2 = vpop.f32.mrf.mxu0 }
 0x116   :  { %v201_v8 = vpop.xlane.xlu0 %200 }
 0x117   :  { %v203_v9 = vsub.f32 %v192_v4, %v201_v8  ;;  %v945_v8 = vld [vmem:[%s1344_s7] ss:$0 sm:$0xff] }
 0x119   :  { %v206_v10 = vmul.f32 1.442695, %v203_v9 }
 0x11b   :  { %949 = vpow2.f32 %v206_v10 }
 0x11e   :  { %v198_v11 = vpop.xlane.xlu0 %197 }
 0x11f   :  { %v202_v12 = vsub.f32 %v167_v6, %v198_v11 }
 0x121   :  { %v950_v13 = vpop.eup %949  ;;  %v204_v14 = vmul.f32 1.442695, %v202_v12 }
 0x122   :  { %v211_v15 = vsel %vm195_vm1, %v950_v13, 0.0 }
 0x123   :  { %951 = vpow2.f32 %v204_v14  ;;  %212 = vadd.xlane.f32.xlu1 %v211_v15 }
 0x129   :  { %v952_v16 = vpop.eup %951 }
 0x12a   :  { %v208_v17 = vsel %vm195_vm1, %v952_v16, 0.0 }
 0x12b   :  { %209 = vadd.xlane.f32.xlu1 %v208_v17 }
 0x196   :  { %v213_v22 = vpop.xlane.xlu1 %212 }
 0x197   :  { %953 = vrcp.f32 %v213_v22  ;;  %v946_v22 = vld [vmem:[%s1344_s7 + $0x1] ss:$0 sm:$0xff] }
 0x19d   :  { %v954_v23 = vpop.eup %953 }
 0x19e   :  { %v210_v25 = vpop.xlane.xlu1 %209  ;;  %v217_v26 = vmul.f32 %v954_v23, %v950_v13 }
 0x19f   :  { %955 = vrcp.f32 %v210_v25 }
 0x1a0   :  { %791 = vmatmul.msk.f32.vlgmr.msra.gmra.mxu3 %vm218_vm2, %v217_v26 }
 0x1a1   :  { %481 = vmatpush.bf16.msra.mxu3 %v917_v24 }
 0x1a5   :  { %v956_v30 = vpop.eup %955  ;;  %482 = vmatpush.bf16.msra.mxu3 %v916_v28 }
 0x1a6   :  { %v216_v31 = vmul.f32 %v956_v30, %v952_v16 }
 0x1a8   :  { %790 = vmatmul.msk.f32.vlgmr.msra.gmra.mxu2 %vm218_vm2, %v216_v31  ;;  %809 = vmatmul.msk.bf16.vlgmr.msrb.gmra.mxu3 %vm144_vm0, %v1295_v29  ;;  %v947_v31 = vld [vmem:[%s1344_s7 + $0x3] ss:$0 sm:$0xff]  ;;  %vm746_vm2 = vcmask 516096  }
 0x1a9   :  { %640 = vmatpush.bf16.msrb.mxu3 %v927_v36  ;;  %451 = vmatpush.bf16.msra.mxu2 %v913_v41 }
 0x1ad   :  { %641 = vmatpush.bf16.msrb.mxu3 %v926_v40  ;;  %452 = vmatpush.bf16.msra.mxu2 %v912_v44 }
 0x1b8   :  { %846 = vmatmul.msk.bf16.vlgmr.msra.gmra.mxu3 %vm144_vm0, %v268_v32 }
 0x223   :  { %v262_v47 = vpop.f32.mrf.mxu3 }
 0x224   :  { %v267_v48 = vpack.c.bf16 %v262_v47, %v262_v47  ;;  %v739_v50 = vrot.slane %v262_v47, 7 }
 0x226   :  { %v280_v49 = vunpack.c.l.b16 %v267_v48 }
 0x228   :  { %v281_v54 = vrot.slane %v280_v49, 7 }
 0x22b   :  { %v239_v51 = vpop.f32.mrf.mxu2  ;;  %v337_v62 = vpop.f32.mrf.mxu3 }
 0x22c   :  { %v266_v52 = vpack.c.bf16 %v239_v51, %v239_v51  ;;  %v740_v53 = vsel %vm282_vm3, %v739_v50, %v239_v51 }
 0x22d   :  { %741 = vrot.lane.b32.xlu2 %v740_v53, %s1212_s4 }
 0x22e   :  { %v279_v55 = vunpack.c.l.b16 %v266_v52 }
 0x230   :  { %v283_v56 = vsel %vm282_vm3, %v281_v54, %v279_v55 }
 0x231   :  { %v284_v57 = vpack.c.b16 %v283_v56, %v283_v56 }
 0x233   :  { %800 = vmatmul.msk.bf16.vlgmr.msrb.gmra.mxu2 %vm144_vm0, %v284_v57  ;;  %828 = vmatmul.msk.bf16.vlgmr.msrb.gmra.mxu1 %vm144_vm0, %v284_v57  ;;  %v339_v63 = vpop.f32.mrf.mxu3 }
 0x234   :  { %857 = vmatmul.msk.bf16.vlgmr.msra.gmra.mxu0 %vm144_vm0, %v284_v57  ;;  %885 = vmatmul.msk.bf16.vlgmr.msrb.gmra.mxu3 %vm144_vm0, %v284_v57 }
 0x235   :  { %695 = vmatpush.bf16.msrb.mxu1 %v929_v58  ;;  %597 = vmatpush.bf16.msrb.mxu2 %v923_v59 }
 0x239   :  { %696 = vmatpush.bf16.msrb.mxu1 %v928_v60  ;;  %598 = vmatpush.bf16.msrb.mxu2 %v922_v61 }
 0x23b   :  { %v484_v1 = vpop.f32.mrf.mxu3 }
 0x243   :  { %837 = vmatmul.msk.bf16.vlgmr.msra.gmra.mxu2 %vm144_vm0, %v1295_v29  ;;  %866 = vmatmul.msk.bf16.vlgmr.msra.gmra.mxu1 %vm144_vm0, %v1295_v29  ;;  %v486_v3 = vpop.f32.mrf.mxu3 }
 0x244   :  { %894 = vmatmul.msk.bf16.vlgmr.msrb.gmra.mxu0 %vm144_vm0, %v1295_v29 }
 0x253   :  { %875 = vmatmul.msk.bf16.vlgmr.msrb.gmra.mxu2 %vm144_vm0, %v268_v32  ;;  %903 = vmatmul.msk.bf16.vlgmr.msrb.gmra.mxu1 %vm144_vm0, %v268_v32 }
 0x2b0   :  { %v429_v4 = vpop.f32.mrf.mxu1 }
 0x2b1   :  { %v545_v5 = vpop.f32.mrf.mxu0 }
 0x2b6   :  { %v309_v6 = vpop.f32.mrf.mxu2 }
 0x2b7   :  { %v338_v7 = vadd.f32 %v337_v62, %v309_v6  ;;  %v643_v9 = vpop.f32.mrf.mxu3 }
 0x2b8   :  { %v431_v10 = vpop.f32.mrf.mxu1 }
 0x2b9   :  { %v373_v11 = vadd.f32 %v369_v0, %v338_v7  ;;  %v547_v12 = vpop.f32.mrf.mxu0  ;;  %v139_v0 = vld [vmem:[#allocation7] sm:$0x3] }
 0x2bb   :  { %v378_v13 = vadd.f32 %v945_v8, %v373_v11 }
 0x2bd   :  { %v819_v14 = vmul.f32 -1.442695, %v378_v13 }
 0x2be   :  { %v311_v15 = vpop.f32.mrf.mxu2 }
 0x2bf   :  { %957 = vpow2.f32 %v819_v14  ;;  %v645_v16 = vpop.f32.mrf.mxu3 }
 0x2c0   :  { %v570_v17 = vpop.f32.mrf.mxu1 }
 0x2c1   :  { %v668_v18 = vpop.f32.mrf.mxu0  ;;  %v571_v38 = vadd.f32 %v570_v17, %v545_v5 }
 0x2c2   :  { %v669_v30 = vadd.f32 %v668_v18, %v643_v9 }
 0x2c5   :  { %v958_v19 = vpop.eup %957 }
 0x2c6   :  { %v454_v20 = vpop.f32.mrf.mxu2  ;;  %v382_v23 = vadd.f32 1.0, %v958_v19 }
 0x2c7   :  { %v455_v21 = vadd.f32 %v454_v20, %v429_v4  ;;  %v742_v20 = vpop.permute.xlu2 %741 }
 0x2c8   :  { %v572_v24 = vpop.f32.mrf.mxu1  ;;  %959 = vrcp.f32 %v382_v23  ;;  %vm388_vm5 = vweird.f32 %v382_v23  ;;  %v394_v56 = vand.u32 2147483648, %v382_v23  ;;  %v392_v58 = vand.u32 2147483647, %v382_v23 }
 0x2c9   :  { %v488_v25 = vadd.f32 %v484_v1, %v455_v21  ;;  %v670_v26 = vpop.f32.mrf.mxu0 }
 0x2ca   :  { %v395_v1 = vor.u32 1.1754944e-38, %v394_v56  ;;  %vm393_vm10 = vcmp.eq.f32.partialorder %v392_v58, 8.507059e+37 }
 0x2cb   :  { %v494_v27 = vadd.f32 %v946_v22, %v488_v25 }
 0x2cd   :  { %v848_v28 = vmul.f32 -1.442695, %v494_v27 }
 0x2ce   :  { %v456_v29 = vpop.f32.mrf.mxu2  ;;  %v960_v34 = vpop.eup %959 }
 0x2cf   :  { %961 = vpow2.f32 %v848_v28  ;;  %v384_v37 = vmul.f32 %v960_v34, %v382_v23  ;;  %vm389_vm4 = vweird.f32 %v960_v34 }
 0x2d0   :  { %v698_v32 = vpop.f32.mrf.mxu1  ;;  %vm390_vm7 = vmor %vm388_vm5, %vm389_vm4 }
 0x2d1   :  { %v702_v33 = vadd.f32 %v698_v32, %v669_v30  ;;  %v385_v45 = vsub.f32 1.0, %v384_v37 }
 0x2d3   :  { %v708_v35 = vadd.f32 %v947_v31, %v702_v33  ;;  %v386_v48 = vmul.f32 %v960_v34, %v385_v45 }
 0x2d5   :  { %v962_v36 = vpop.eup %961  ;;  %v905_v39 = vmul.f32 -1.442695, %v708_v35  ;;  %v387_v54 = vadd.f32 %v960_v34, %v386_v48 }
 0x2d6   :  { %v498_v40 = vadd.f32 1.0, %v962_v36  ;;  %v600_v41 = vpop.f32.mrf.mxu2 }
 0x2d7   :  { %963 = vpow2.f32 %v905_v39  ;;  %v604_v42 = vadd.f32 %v600_v41, %v571_v38  ;;  %v391_v61 = vsel %vm390_vm7, %v960_v34, %v387_v54 }
 0x2d8   :  { %965 = vrcp.f32 %v498_v40  ;;  %v700_v44 = vpop.f32.mrf.mxu1  ;;  %v510_v55 = vand.u32 2147483648, %v498_v40  ;;  %v508_v59 = vand.u32 2147483647, %v498_v40  ;;  %vm504_vm8 = vweird.f32 %v498_v40 }
 0x2d9   :  { %v610_v46 = vadd.f32 %v948_v43, %v604_v42  ;;  %v396_v5 = vsel %vm393_vm10, %v395_v1, %v391_v61 }
 0x2da   :  { %v511_v2 = vor.u32 1.1754944e-38, %v510_v55  ;;  %vm509_vm11 = vcmp.eq.f32.partialorder %v508_v59, 8.507059e+37 }
 0x2db   :  { %967 = vtanh.f32 %v610_v46 }
 0x2dd   :  { %v964_v47 = vpop.eup %963 }
 0x2de   :  { %v966_v49 = vpop.eup %965  ;;  %v712_v50 = vadd.f32 1.0, %v964_v47  ;;  %v602_v51 = vpop.f32.mrf.mxu2 }
 0x2df   :  { %v500_v52 = vmul.f32 %v966_v49, %v498_v40  ;;  %vm505_vm6 = vweird.f32 %v966_v49 }
 0x2e0   :  { %969 = vrcp.f32 %v712_v50  ;;  %vm506_vm9 = vmor %vm504_vm8, %vm505_vm6  ;;  %v724_v13 = vand.u32 2147483648, %v712_v50  ;;  %vm718_vm14 = vweird.f32 %v712_v50  ;;  %v722_v14 = vand.u32 2147483647, %v712_v50 }
 0x2e1   :  { %v501_v53 = vsub.f32 1.0, %v500_v52  ;;  %v968_v60 = vpop.eup %967 }
 0x2e2   :  { %v729_v9 = vmul.f32 %v968_v60, %v396_v5  ;;  %v725_v16 = vor.u32 1.1754944e-38, %v724_v13  ;;  %vm723_vm1 = vcmp.eq.f32.partialorder %v722_v14, 8.507059e+37 }
 0x2e3   :  { %v502_v57 = vmul.f32 %v966_v49, %v501_v53 }
 0x2e5   :  { %v503_v62 = vadd.f32 %v966_v49, %v502_v57 }
 0x2e6   :  { %v970_v63 = vpop.eup %969 }
 0x2e7   :  { %v714_v3 = vmul.f32 %v970_v63, %v712_v50  ;;  %v507_v4 = vsel %vm506_vm9, %v966_v49, %v503_v62  ;;  %vm719_vm13 = vweird.f32 %v970_v63 }
 0x2e8   :  { %v512_v6 = vsel %vm509_vm11, %v511_v2, %v507_v4  ;;  %vm720_vm15 = vmor %vm718_vm14, %vm719_vm13 }
 0x2e9   :  { %v715_v7 = vsub.f32 1.0, %v714_v3  ;;  %v728_v8 = vmul.f32 %v512_v6, %v139_v0 }
 0x2eb   :  { %v716_v10 = vmul.f32 %v970_v63, %v715_v7  ;;  %v730_v11 = vadd.f32 %v729_v9, %v728_v8 }
 0x2ed   :  { %v717_v12 = vadd.f32 %v970_v63, %v716_v10  ;;  %971 = vtanh.f32 %v730_v11  ;;  %736 = vst.msk [vmem:[#allocation14 + $0x2] sm:$0x3] %vm733_vm12, %v730_v11 }
 0x2ef   :  { %v721_v15 = vsel %vm720_vm15, %v970_v63, %v717_v12 }
 0x2f0   :  { %v726_v18 = vsel %vm723_vm1, %v725_v16, %v721_v15 }
 0x2f3   :  { %v972_v17 = vpop.eup %971 }
 0x2f4   :  { %v732_v19 = vmul.f32 %v972_v17, %v726_v18 }
 0x2f6   :  { %734 = vst.msk [vmem:[#allocation14] sm:$0x3] %vm733_vm12, %v732_v19  ;;  %v744_v21 = vsel %vm144_vm0, %v732_v19, %v742_v20 }
 0x2f7   :  { %760 = dma.vmem_to_hbm [thread:$0]  %s753_s30, 64, %s755_s28, [#allocation4], %s1212_s4, %s1212_s4, %s1215_s8   ;;  %v745_v22 = vpack.c.bf16 %v744_v21, %v744_v21 }
 0x2f9   :  { %747 = vst.msk [vmem:[#allocation15] sm:$0x1] %vm746_vm2, %v745_v22 }
 0x2fa   :  { %771 = dma.vmem_to_hbm [thread:$0]  %s767_s11, 16, %s769_s13, [#allocation16]  }
 0x2fb   :  { %1197 = dma.done.wait [#allocation4], 64  }
 0x2fc   :  { %1198 = vsyncadd [#allocation4], 4294967232 }
 0x2fd   :  { %1199 = dma.done.wait [#allocation16], 16  }
 0x2fe   :  { %1200 = vsyncadd [#allocation16], 4294967280 }
 0x2ff   :  { %780 = vsyncpa [#allocation3], 1 }
 0x300   :  { %781 = vsyncpa [#allocation6], 1 }
 0x301   :  { %782 = vsyncpa [#allocation9], 1 }
 0x302   :  { %783 = vsyncpa [#allocation12], 1 }
 0x303   :  { %784 = vsyncpa [#allocation4], 1 }
 0x304   :  { %785 = vsyncpa [#allocation16], 1 }

</bundles_post_ra>
